<compile_context>
chip_gen: v6e
topology: v6e:2x2x1
jax: 0.10.0
libtpu: 0.0.40
codegen_flags: <defaults>
</compile_context>

<pallas_src>
import functools

import jax
import jax.numpy as jnp
from jax.experimental import pallas as pl
from jax.experimental.pallas import tpu as pltpu

LANE = 128


def _round_up(x, m):
    return (x + m - 1) // m * m


def actor_kernel(x_ref, w1_ref, b1_ref, w2_ref, b2_ref, w3_ref, b3_ref,
                 o_ref, *, max_action):
    # bf16 operands on the MXU, f32 accumulation, f32 epilogue (cast at store).
    x = x_ref[...].astype(jnp.bfloat16)

    # Layer 1: Linear + ReLU
    h1 = jnp.dot(x, w1_ref[...], preferred_element_type=jnp.float32)
    h1 = jnp.maximum(h1 + b1_ref[...], 0.0)

    # Layer 2: Linear + ReLU
    h2 = jnp.dot(h1.astype(jnp.bfloat16), w2_ref[...],
                 preferred_element_type=jnp.float32)
    h2 = jnp.maximum(h2 + b2_ref[...], 0.0)

    # Layer 3: Linear + tanh (EUP), scaled by max_action; cast at the store.
    h3 = jnp.dot(h2.astype(jnp.bfloat16), w3_ref[...],
                 preferred_element_type=jnp.float32)
    o_ref[...] = (max_action * jnp.tanh(h3 + b3_ref[...])).astype(o_ref.dtype)


def init_params(key, state_dim, fc1_dims, fc2_dims, action_dim):
    """PyTorch-Linear-style init; weights stored transposed as (in, out)."""
    ks = jax.random.split(key, 6)

    def lin(kw, kb, fan_in, fan_out):
        bound = 1.0 / jnp.sqrt(fan_in)
        w = jax.random.uniform(kw, (fan_in, fan_out), jnp.float32, -bound, bound)
        b = jax.random.uniform(kb, (1, fan_out), jnp.float32, -bound, bound)
        return w, b

    w1, b1 = lin(ks[0], ks[1], state_dim, fc1_dims)
    w2, b2 = lin(ks[2], ks[3], fc1_dims, fc2_dims)
    w3, b3 = lin(ks[4], ks[5], fc2_dims, action_dim)
    return {"w1": w1, "b1": b1, "w2": w2, "b2": b2, "w3": w3, "b3": b3}


def prepare_params(params, action_dim):
    """One-time prep: zero-pad feature dims to multiples of 128 (lane-dense,
    full MXU passes) and cast weights to bf16.  Biases stay f32."""
    w1, b1 = params["w1"], params["b1"]
    w2, b2 = params["w2"], params["b2"]
    w3, b3 = params["w3"], params["b3"]
    f1p = _round_up(w1.shape[1], LANE)
    f2p = _round_up(w2.shape[1], LANE)
    ap = _round_up(w3.shape[1], LANE)

    def pad2(a, rows, cols):
        return jnp.pad(a, ((0, rows - a.shape[0]), (0, cols - a.shape[1])))

    return {
        "w1": pad2(w1, w1.shape[0], f1p).astype(jnp.bfloat16),
        "b1": pad2(b1, 1, f1p),
        "w2": pad2(w2, f1p, f2p).astype(jnp.bfloat16),
        "b2": pad2(b2, 1, f2p),
        "w3": pad2(w3, f2p, ap).astype(jnp.bfloat16),
        "b3": pad2(b3, 1, ap),
        "action_dim": int(action_dim),
    }


def actor_reference_f32(s, params, max_action):
    h1 = jnp.maximum(s @ params["w1"] + params["b1"], 0.0)
    h2 = jnp.maximum(h1 @ params["w2"] + params["b2"], 0.0)
    return max_action * jnp.tanh(h2 @ params["w3"] + params["b3"])


def actor_reference_bf16(s, prepped, max_action):
    """Pure-XLA path mirroring the kernel's bf16-operand / f32-accumulate math.
    Also used as the small-batch fast path."""
    ad = prepped["action_dim"]
    x = s.astype(jnp.bfloat16)
    h1 = jnp.maximum(
        jnp.dot(x, prepped["w1"], preferred_element_type=jnp.float32)
        + prepped["b1"], 0.0)
    h2 = jnp.maximum(
        jnp.dot(h1.astype(jnp.bfloat16), prepped["w2"],
                preferred_element_type=jnp.float32) + prepped["b2"], 0.0)
    h3 = jnp.dot(h2.astype(jnp.bfloat16), prepped["w3"],
                 preferred_element_type=jnp.float32) + prepped["b3"]
    return (max_action * jnp.tanh(h3))[:, :ad]


def actor_forward(s, prepped, max_action, *, tb=1024, use_fast_path=True,
                  out_dtype=jnp.bfloat16):
    """s: (B, state_dim) float32.  prepped: output of prepare_params.
    Returns (B, action_dim) float32 actions."""
    B, S = s.shape
    action_dim = prepped["action_dim"]

    # Small-batch fast path: the custom-call launch + single grid step dwarfs
    # the actual math; the fused XLA path wins outright.
    if use_fast_path and B <= 64:
        return actor_reference_bf16(s, prepped, max_action).astype(jnp.float32)

    w1, b1 = prepped["w1"], prepped["b1"]
    w2, b2 = prepped["w2"], prepped["b2"]
    w3, b3 = prepped["w3"], prepped["b3"]
    F1P, F2P, AP = w1.shape[1], w2.shape[1], w3.shape[1]

    # Balanced batch tiling: pad B only to a multiple of 8, split into n
    # near-equal tiles (<= 8 rows of padding waste).  Force n >= 2 when the
    # batch allows it so the "parallel" grid axis can shard across v7x's two
    # TensorCores (negligible extra step overhead on v5e/v6e).
    B8 = _round_up(B, 8)
    n = pl.cdiv(B8, tb)
    if B8 >= 16:
        n = max(n, 2)
    TB = _round_up(pl.cdiv(B8, n), 8)
    B_pad = n * TB
    if B_pad != B:
        s = jnp.pad(s, ((0, B_pad - B), (0, 0)))
    grid = (n,)

    # Advisory cost so XLA can overlap this small custom call with other work.
    flops = 2 * B_pad * (S * F1P + F1P * F2P + F2P * AP)
    out_bytes = B_pad * AP * jnp.dtype(out_dtype).itemsize
    bytes_accessed = (B_pad * S * 4 + out_bytes
                      + (w1.size + w2.size + w3.size) * 2
                      + (b1.size + b2.size + b3.size) * 4)
    cost = pl.CostEstimate(flops=flops,
                           transcendentals=B_pad * AP,
                           bytes_accessed=bytes_accessed)

    kernel = functools.partial(actor_kernel, max_action=float(max_action))
    out = pl.pallas_call(
        kernel,
        # bf16 output slab halves the dominant HBM writeback traffic.
        out_shape=jax.ShapeDtypeStruct((B_pad, AP), out_dtype),
        grid=grid,
        in_specs=[
            # Batch-tiled input (pipelined across grid steps).
            pl.BlockSpec((TB, S), lambda i: (i, 0)),
            # Weights / biases: same block every step -> VMEM-resident, one DMA.
            pl.BlockSpec((S, F1P), lambda i: (0, 0)),
            pl.BlockSpec((1, F1P), lambda i: (0, 0)),
            pl.BlockSpec((F1P, F2P), lambda i: (0, 0)),
            pl.BlockSpec((1, F2P), lambda i: (0, 0)),
            pl.BlockSpec((F2P, AP), lambda i: (0, 0)),
            pl.BlockSpec((1, AP), lambda i: (0, 0)),
        ],
        # Lane-dense (TB, 128) output slab; sliced/upcast in the wrapper.
        out_specs=pl.BlockSpec((TB, AP), lambda i: (i, 0)),
        compiler_params=pltpu.CompilerParams(
            dimension_semantics=("parallel",)),
        cost_estimate=cost,
    )(s, w1, b1, w2, b2, w3, b3)
    return out[:B, :action_dim].astype(jnp.float32)


if __name__ == "__main__":
    # Small shapes consistent with the module's forward.
    batch = 16
    state_dim = 16
    fc1_dims = 32
    fc2_dims = 32
    action_dim = 8
    max_action = 2.0

    key = jax.random.PRNGKey(0)
    k_s, k_p = jax.random.split(key)
    s = jax.random.normal(k_s, (batch, state_dim), jnp.float32)
    params = init_params(k_p, state_dim, fc1_dims, fc2_dims, action_dim)
    prepped = prepare_params(params, action_dim)

    # Force the Pallas path (fast path off) with tb=8 -> grid=(2,): exercises
    # the batch-tiled, multi-step pipeline even at this tiny size.
    a = actor_forward(s, prepped, max_action, tb=8, use_fast_path=False)
    a = jax.block_until_ready(a)

    # Default-argument call (small batch -> XLA fast path) as a sanity check.
    a_fast = jax.block_until_ready(actor_forward(s, prepped, max_action))

    a_bf16 = actor_reference_bf16(s, prepped, max_action)  # same-precision mirror
    a_f32 = actor_reference_f32(s, params, max_action)     # full-f32 semantics

    assert a.shape == (batch, action_dim)
    assert a_fast.shape == (batch, action_dim)
    # bf16 output slab -> ~3 significant digits; tolerances reflect that.
    assert jnp.allclose(a, a_bf16, atol=1.5e-2, rtol=1.5e-2), \
        float(jnp.max(jnp.abs(a - a_bf16)))
    assert jnp.allclose(a, a_f32, atol=6e-2, rtol=6e-2), \
        float(jnp.max(jnp.abs(a - a_f32)))
    assert jnp.allclose(a_fast, a_f32, atol=6e-2, rtol=6e-2), \
        float(jnp.max(jnp.abs(a_fast - a_f32)))

    print("KERNEL_OK")
</pallas_src>

<mosaic_0001>
module attributes {stable_mosaic.version = 11 : i64} {
  func.func @actor_kernel(%arg0: i32, %arg1: memref<8x16xf32, #tpu.memory_space<vmem>>, %arg2: memref<16x128xbf16, #tpu.memory_space<vmem>>, %arg3: memref<1x128xf32, #tpu.memory_space<vmem>>, %arg4: memref<128x128xbf16, #tpu.memory_space<vmem>>, %arg5: memref<1x128xf32, #tpu.memory_space<vmem>>, %arg6: memref<128x128xbf16, #tpu.memory_space<vmem>>, %arg7: memref<1x128xf32, #tpu.memory_space<vmem>>, %arg8: memref<8x128xbf16, #tpu.memory_space<vmem>>) attributes {dimension_semantics = [#tpu.dimension_semantics<parallel>], iteration_bounds = array<i64: 2>, scalar_prefetch = 0 : i64, scratch_operands = 0 : i64, tpu.core_type = #tpu.core_type<tc>, window_params = [{transform_indices = @transform_0, window_bounds = array<i64: 8, 16>}, {pipeline_mode = #tpu.pipeline_mode<synchronous>, transform_indices = @transform_1, window_bounds = array<i64: 16, 128>}, {pipeline_mode = #tpu.pipeline_mode<synchronous>, transform_indices = @transform_2, window_bounds = array<i64: 1, 128>}, {pipeline_mode = #tpu.pipeline_mode<synchronous>, transform_indices = @transform_3, window_bounds = array<i64: 128, 128>}, {pipeline_mode = #tpu.pipeline_mode<synchronous>, transform_indices = @transform_4, window_bounds = array<i64: 1, 128>}, {pipeline_mode = #tpu.pipeline_mode<synchronous>, transform_indices = @transform_5, window_bounds = array<i64: 128, 128>}, {pipeline_mode = #tpu.pipeline_mode<synchronous>, transform_indices = @transform_6, window_bounds = array<i64: 1, 128>}, {transform_indices = @transform_7, window_bounds = array<i64: 8, 128>}]} {
    %c0 = arith.constant 0 : index
    %c0_0 = arith.constant 0 : index
    %0 = vector.load %arg1[%c0, %c0_0] : memref<8x16xf32, #tpu.memory_space<vmem>>, vector<8x16xf32>
    %1 = arith.truncf %0 : vector<8x16xf32> to vector<8x16xbf16>
    %c0_1 = arith.constant 0 : index
    %c0_2 = arith.constant 0 : index
    %2 = vector.load %arg2[%c0_1, %c0_2] : memref<16x128xbf16, #tpu.memory_space<vmem>>, vector<16x128xbf16>
    %cst = arith.constant dense<0.000000e+00> : vector<8x128xf32>
    %3 = tpu.matmul %1, %2, %cst {dimension_numbers = #tpu.dot_dimension_numbers<[1], [0], [0], [1], [0, 0, 1, 1], [], []>} : vector<8x16xbf16>, vector<16x128xbf16>, vector<8x128xf32> -> vector<8x128xf32>
    %c0_3 = arith.constant 0 : index
    %c0_4 = arith.constant 0 : index
    %4 = vector.load %arg3[%c0_3, %c0_4] : memref<1x128xf32, #tpu.memory_space<vmem>>, vector<1x128xf32>
    %5 = vector.broadcast %4 : vector<1x128xf32> to vector<8x128xf32>
    %6 = arith.addf %3, %5 : vector<8x128xf32>
    %cst_5 = arith.constant 0.000000e+00 : f32
    %7 = vector.broadcast %cst_5 : f32 to vector<8x128xf32>
    %8 = arith.maximumf %6, %7 : vector<8x128xf32>
    %9 = arith.truncf %8 : vector<8x128xf32> to vector<8x128xbf16>
    %c0_6 = arith.constant 0 : index
    %c0_7 = arith.constant 0 : index
    %10 = vector.load %arg4[%c0_6, %c0_7] : memref<128x128xbf16, #tpu.memory_space<vmem>>, vector<128x128xbf16>
    %cst_8 = arith.constant dense<0.000000e+00> : vector<8x128xf32>
    %11 = tpu.matmul %9, %10, %cst_8 {dimension_numbers = #tpu.dot_dimension_numbers<[1], [0], [0], [1], [0, 0, 1, 1], [], []>} : vector<8x128xbf16>, vector<128x128xbf16>, vector<8x128xf32> -> vector<8x128xf32>
    %c0_9 = arith.constant 0 : index
    %c0_10 = arith.constant 0 : index
    %12 = vector.load %arg5[%c0_9, %c0_10] : memref<1x128xf32, #tpu.memory_space<vmem>>, vector<1x128xf32>
    %13 = vector.broadcast %12 : vector<1x128xf32> to vector<8x128xf32>
    %14 = arith.addf %11, %13 : vector<8x128xf32>
    %cst_11 = arith.constant 0.000000e+00 : f32
    %15 = vector.broadcast %cst_11 : f32 to vector<8x128xf32>
    %16 = arith.maximumf %14, %15 : vector<8x128xf32>
    %17 = arith.truncf %16 : vector<8x128xf32> to vector<8x128xbf16>
    %c0_12 = arith.constant 0 : index
    %c0_13 = arith.constant 0 : index
    %18 = vector.load %arg6[%c0_12, %c0_13] : memref<128x128xbf16, #tpu.memory_space<vmem>>, vector<128x128xbf16>
    %cst_14 = arith.constant dense<0.000000e+00> : vector<8x128xf32>
    %19 = tpu.matmul %17, %18, %cst_14 {dimension_numbers = #tpu.dot_dimension_numbers<[1], [0], [0], [1], [0, 0, 1, 1], [], []>} : vector<8x128xbf16>, vector<128x128xbf16>, vector<8x128xf32> -> vector<8x128xf32>
    %c0_15 = arith.constant 0 : index
    %c0_16 = arith.constant 0 : index
    %20 = vector.load %arg7[%c0_15, %c0_16] : memref<1x128xf32, #tpu.memory_space<vmem>>, vector<1x128xf32>
    %21 = vector.broadcast %20 : vector<1x128xf32> to vector<8x128xf32>
    %22 = arith.addf %19, %21 : vector<8x128xf32>
    %23 = math.tanh %22 : vector<8x128xf32>
    %cst_17 = arith.constant 2.000000e+00 : f32
    %24 = vector.broadcast %cst_17 : f32 to vector<8x128xf32>
    %25 = arith.mulf %24, %23 : vector<8x128xf32>
    %26 = arith.truncf %25 : vector<8x128xf32> to vector<8x128xbf16>
    %c0_18 = arith.constant 0 : index
    %c0_19 = arith.constant 0 : index
    %27 = vector.load %arg8[%c0_18, %c0_19] : memref<8x128xbf16, #tpu.memory_space<vmem>>, vector<8x128xbf16>
    tpu.vector_store %arg8[%c0_18, %c0_19], %26 {strides = array<i32>} : memref<8x128xbf16, #tpu.memory_space<vmem>>, vector<8x128xbf16>,
    return
  }
  func.func @transform_0(%arg0: i32) -> (i32, i32) {
    %c0_i32 = arith.constant 0 : i32
    %c0_i32_0 = arith.constant 0 : i32
    return %arg0, %c0_i32 : i32, i32
  }
  func.func @transform_1(%arg0: i32) -> (i32, i32) {
    %c0_i32 = arith.constant 0 : i32
    %c0_i32_0 = arith.constant 0 : i32
    %c0_i32_1 = arith.constant 0 : i32
    return %c0_i32, %c0_i32_0 : i32, i32
  }
  func.func @transform_2(%arg0: i32) -> (i32, i32) {
    %c0_i32 = arith.constant 0 : i32
    %c0_i32_0 = arith.constant 0 : i32
    %c0_i32_1 = arith.constant 0 : i32
    return %c0_i32, %c0_i32_0 : i32, i32
  }
  func.func @transform_3(%arg0: i32) -> (i32, i32) {
    %c0_i32 = arith.constant 0 : i32
    %c0_i32_0 = arith.constant 0 : i32
    %c0_i32_1 = arith.constant 0 : i32
    return %c0_i32, %c0_i32_0 : i32, i32
  }
  func.func @transform_4(%arg0: i32) -> (i32, i32) {
    %c0_i32 = arith.constant 0 : i32
    %c0_i32_0 = arith.constant 0 : i32
    %c0_i32_1 = arith.constant 0 : i32
    return %c0_i32, %c0_i32_0 : i32, i32
  }
  func.func @transform_5(%arg0: i32) -> (i32, i32) {
    %c0_i32 = arith.constant 0 : i32
    %c0_i32_0 = arith.constant 0 : i32
    %c0_i32_1 = arith.constant 0 : i32
    return %c0_i32, %c0_i32_0 : i32, i32
  }
  func.func @transform_6(%arg0: i32) -> (i32, i32) {
    %c0_i32 = arith.constant 0 : i32
    %c0_i32_0 = arith.constant 0 : i32
    %c0_i32_1 = arith.constant 0 : i32
    return %c0_i32, %c0_i32_0 : i32, i32
  }
  func.func @transform_7(%arg0: i32) -> (i32, i32) {
    %c0_i32 = arith.constant 0 : i32
    %c0_i32_0 = arith.constant 0 : i32
    return %arg0, %c0_i32 : i32, i32
  }
}

</mosaic_0001>

<bundles_post_ra>
// kernel: tpu_custom_call.1
= control target key start
LH: loop header
LB: loop body
LE: loop exit
PB: predicated region body
PF: predicated region fallthrough
CT: control target
= control target key end

     0   :  { %s1384_s0 = inlined_call_operand.hbm [shape: f32[16,16], index: 0, kind: input, shape index: {}]   ;;  %s1385_s1 = inlined_call_operand.hbm [shape: bf16[16,128], index: 1, kind: input, shape index: {}]   ;;  %s1386_s2 = inlined_call_operand.vmem [shape: f32[1,128], index: 2, kind: input, shape index: {}]   ;;  %s1387_s3 = inlined_call_operand.hbm [shape: bf16[128,128], index: 3, kind: input, shape index: {}]   ;;  %s1388_s4 = inlined_call_operand.vmem [shape: f32[1,128], index: 4, kind: input, shape index: {}]   ;;  %s1389_s5 = inlined_call_operand.hbm [shape: bf16[128,128], index: 5, kind: input, shape index: {}]   ;;  %s1390_s6 = inlined_call_operand.vmem [shape: f32[1,128], index: 6, kind: input, shape index: {}]   ;;  %s1391_s7 = inlined_call_operand.hbm [shape: bf16[16,128], index: 7, kind: output, shape index: {}]  }
   0x1   :  { %1396 = sst [smem:[#allocation15_spill]] %s1385_s1 }
   0x2   :  { %1397 = sst [smem:[#allocation16_spill]] %s1387_s3 }
   0x3   :  { %12 = vsyncpa [#allocation3], 0 }
   0x4   :  { %14 = vsyncpa [#allocation3 + $0x1], 0 }
   0x5   :  { %15 = vsyncpa [#allocation6], 0 }
   0x6   :  { %16 = vsyncpa [#allocation9], 0 }
   0x7   :  { %17 = vsyncpa [#allocation4], 0 }
   0x8   :  { %19 = vsyncpa [#allocation4 + $0x1], 0  ;;  %s1177_s24 = smov 0   ;;  %s1179_s25 = smov 0  }
   0x9   :  { %s1181_s26 = smov 0   ;;  %s1183_s27 = smov 0  }
   0xa LB: > { %s1198_s28 = sadd.s32 4294967295, %s1126_s27   ;;  %s743_s29 = sadd.s32 4294967294, %s1126_s27   ;;  %s1126_s27 = sphi %s1183_s27, %s1419_s27   ;;  %s1122_s26 = sphi %s1181_s26, %s1418_s26   ;;  %s1118_s25 = sphi %s1179_s25, %s1417_s25   ;;  %s1114_s24 = sphi %s1177_s24, %s1416_s24  }
   0xb   : > { %p45_p0 = scmp.ne.s32.totalorder %s1118_s25, %s1114_s24  ;;  %p1392_p1 = scmp.eq.s32.totalorder %s1198_s28, 0 }
   0xc   : > { %p201_p3 = scmp.eq.s32.totalorder %s743_s29, 1  ;;  %p744_p5 = scmp.ge.s32.totalorder %s1126_s27, 1 }
   0xd   : > { %p1207_p4 = por %p1392_p1, %p45_p0  ;;  %p208_p7 = scmp.lt.s32.totalorder %s1126_s27, 3 }
   0xe   : > { %p1212_p6 = por %p201_p3, %p45_p0  ;;  %s1128_s10 = smov [#allocation5]  }
   0xf   : > { %s1398_s30 = scalar_select %p1207_p4, 1, 0 }
  0x10   : > { %s1399_s8 = scalar_select %p1212_p6, 1, 0 }
  0x11   : > { %p1217_p8 = pnand %p744_p5, %p208_p7  ;;  %s220_s11 = sshll.u32 %s1128_s10, 4  ;;  %s221_s11 = int_to_ptr.vmem [resolvable:$true] %s220_s11 }
  0x12   : > { %s1129_s13 = smov [#allocation7]   ;;  %s1130_s15 = smov [#allocation8]  }
  0x13   : > { %s1400_s9 = scalar_select %p1217_p8, 1, 0 }
  0x14   : > { %p864_p9 = pneg %p1217_p8  ;;  %s236_s14 = sshll.u32 %s1129_s13, 4  ;;  %s237_s14 = int_to_ptr.vmem [resolvable:$true] %s236_s14 }
  0x15   : > { %s252_s16 = sshll.u32 %s1130_s15, 4  ;;  %s959_s17 = scalar_lea.vmem %s221_s11, 128  ;;  %s253_s16 = int_to_ptr.vmem [resolvable:$true] %s252_s16 }
  0x16   : > { %p1226_p11 = pnand %p864_p9, %p1392_p1  ;;  %p960_p13 = scmp.ne.s32.totalorder %s221_s11, %s959_s17 }
  0x17   : > { %p967_p5 = scmp.lt.s32.totalorder %s221_s11, %s221_s11  ;;  %p968_p7 = scmp.lt.s32.totalorder %s959_s17, %s959_s17 }
  0x18   : > { %p950_p12 = pneg %p1226_p11 }
  0x19   : > { %p969_p9 = por %p968_p7, %p967_p5 }
  0x1a   : > { %p962_p0 = pnand %p960_p13, %p950_p12 }
  0x1c   : > { %p963_p3 = pneg %p962_p0 }
  0x1e   : > { %p970_p10 = pnand %p969_p9, %p963_p3 }
  0x20   : > { %973 = shalt.err (!%p970_p10)
}
  0x21   : > { %s1131_s18 = smov 64   ;;  %s1132_s19 = smov 4  }
  0x22   : > { %s1402_s1 = sld [smem:[#allocation15_spill]]  ;;  %s985_s22 = scalar_lea.vmem %s237_s14, 1024 }
  0x23   : > { %p986_p1 = scmp.ne.s32.totalorder %s237_s14, %s985_s22  ;;  %p993_p2 = scmp.lt.s32.totalorder %s237_s14, %s237_s14 }
  0x24   : > { %p994_p6 = scmp.lt.s32.totalorder %s985_s22, %s985_s22 }
  0x25   : > { %p988_p13 = pnand %p986_p1, %p950_p12 }
  0x26   : > { %p995_p5 = por %p994_p6, %p993_p2 }
  0x27   : > { %p989_p0 = pneg %p988_p13 }
  0x28   : > { %867 = dma.hbm_to_vmem [thread:$0]  (!%p1226_p11), %s1402_s1, 128, %s221_s11, [#allocation6], %s1131_s18, %s1131_s18, %s1132_s19  }
  0x29   : > { %p996_p3 = pnand %p995_p5, %p989_p0 }
  0x2b   : > { %999 = shalt.err (!%p996_p3)
}
  0x2c   : > { %s1403_s3 = sld [smem:[#allocation16_spill]]  ;;  %s1011_s10 = scalar_lea.vmem %s253_s16, 1024 }
  0x2d   : > { %p1012_p10 = scmp.ne.s32.totalorder %s253_s16, %s1011_s10  ;;  %p1019_p9 = scmp.lt.s32.totalorder %s253_s16, %s253_s16 }
  0x2e   : > { %p1020_p13 = scmp.lt.s32.totalorder %s1011_s10, %s1011_s10 }
  0x2f   : > { %p1014_p7 = pnand %p1012_p10, %p950_p12 }
  0x30   : > { %p1021_p4 = por %p1020_p13, %p1019_p9 }
  0x31   : > { %p1015_p1 = pneg %p1014_p7 }
  0x32   : > { %870 = dma.hbm_to_vmem [thread:$0]  (!%p1226_p11), %s1403_s3, 1024, %s237_s14, [#allocation6], %s1131_s18, %s1131_s18, %s1132_s19  }
  0x33   : > { %p1022_p2 = pnand %p1021_p4, %p1015_p1 }
  0x35   : > { %1025 = shalt.err (!%p1022_p2)
}
  0x36   : > { %873 = dma.hbm_to_vmem [thread:$0]  (!%p1226_p11), %s1389_s5, 1024, %s253_s16, [#allocation9], %s1131_s18, %s1131_s18, %s1132_s19  }
  0x37   : > { %s1257_s14 = sadd.s32 1, %s1126_s27   ;;  %s32_s12 = sadd.s32 1, %s1122_s26 }
  0x38   : > { %s29_s15 = ssub.s32 %s1126_s27, %s1257_s14  ;;  %p39_p6 = scmp.ne.s32.totalorder %s1122_s26, %s1118_s25 }
  0x39   : > { %p30_p4 = scmp.eq.s32.totalorder %s29_s15, 0  ;;  %p40_p12 = scmp.eq.s32.totalorder %s1126_s27, 0 }
  0x3a   : > { %p885_p0 = scmp.lt.s32.totalorder %s1126_s27, 2  ;;  %p1404_p3 = scmp.eq.s32.totalorder %s1198_s28, 1 }
  0x3b   : > { %s1267_s17 = scalar_select %p30_p4, %s1122_s26, %s32_s12  }
  0x3c   : > { %p41_p5 = por %p40_p12, %p39_p6  ;;  %p1271_p10 = por %p1404_p3, %p39_p6 }
  0x3d   : > { %s269_s21 = sand.u32 1, %s1122_s26   ;;  %s750_s22 = sshll.u32 %s1126_s27, 7 }
  0x3e   : > { %s1405_s20 = scalar_select %p1271_p10, 1, 0 }
  0x3f   : > { %s749_s16 = sshll.u32 %s269_s21, 3  ;;  %s1280_s23 = scalar_lea.hbm %s1384_s0, %s750_s22 }
  0x40   : > { %s273_s29 = scalar_lea.vmem [#allocation2], %s749_s16  ;;  %p1282_p11 = pnand %p885_p0, %p41_p5 }
  0x41   : > { %s280_s10 = sshll.u32 %s273_s29, 4  ;;  %s270_s13 = scalar_lea.sflag [#allocation3], %s269_s21  ;;  %s281_s10 = int_to_ptr.vmem [resolvable:$true] %s280_s10 }
  0x42   : > { %s1026_s15 = scalar_lea.hbm %s1280_s23, 128  ;;  %p1028_p1 = pneg %p1282_p11 }
  0x43   : > { %p1027_p7 = scmp.ne.s32.totalorder %s1280_s23, %s1026_s15  ;;  %s1031_s18 = scalar_lea.hbm %s1384_s0, 256 }
  0x44   : > { %p1032_p2 = scmp.lt.s32.totalorder %s1280_s23, %s1384_s0  ;;  %p1033_p4 = scmp.lt.s32.totalorder %s1031_s18, %s1026_s15 }
  0x45   : > { %p1029_p9 = pnand %p1028_p1, %p1027_p7 }
  0x46   : > { %p1034_p6 = por %p1033_p4, %p1032_p2 }
  0x47   : > { %p1030_p13 = pneg %p1029_p9 }
  0x49   : > { %p1035_p12 = pnand %p1034_p6, %p1030_p13 }
  0x4b   : > { %1038 = shalt.err (!%p1035_p12)
}
  0x4c   : > { %s1039_s29 = scalar_lea.vmem %s281_s10, 128  ;;  %s1133_s21 = smov [#allocation2]  }
  0x4d   : > { %p1040_p0 = scmp.ne.s32.totalorder %s281_s10, %s1039_s29  ;;  %s1044_s1 = sshll.u32 %s1133_s21, 4  ;;  %s1045_s1 = int_to_ptr.vmem [resolvable:$false] %s1044_s1 }
  0x4e   : > { %s1046_s3 = scalar_lea.vmem %s1045_s1, 256  ;;  %p1047_p7 = scmp.lt.s32.totalorder %s281_s10, %s1045_s1 }
  0x4f   : > { %p1042_p5 = pnand %p1040_p0, %p1028_p1  ;;  %p1048_p9 = scmp.lt.s32.totalorder %s1046_s3, %s1039_s29 }
  0x51   : > { %p1043_p3 = pneg %p1042_p5  ;;  %p1049_p10 = por %p1048_p9, %p1047_p7 }
  0x53   : > { %p1050_p8 = pnand %p1049_p10, %p1043_p3 }
  0x55   : > { %1053 = shalt.err (!%p1050_p8)
}
  0x56   : > { %877 = dma.hbm_to_vmem [thread:$0]  (!%p1282_p11), %s1280_s23, 128, %s281_s10, %s270_s13  }
  0x57   : > { %p1407_p13 = scmp.ne.s32.totalorder %s1400_s9, 0 }
  0x58   : > { %s1303_s15 = sand.u32 (!%p1407_p13), 1, %s1118_s25   ;;  %p1408_p1 = scmp.ne.s32.totalorder (!%p1407_p13), %s1398_s30, 0 }
  0x59   : > { %289 = sbr.rel (%p1407_p13) target bundleno = 731 (0x2db), region = 48  ;;  %s752_s12 = sshll.u32 (!%p1407_p13), %s1303_s15, 3 }
  0x5a   : > { %s292_s22 = scalar_lea.sflag (!%p1407_p13), [#allocation3], %s1303_s15  ;;  %s295_s1 = scalar_lea.vmem (!%p1407_p13), [#allocation2], %s752_s12 }
  0x5e   : > { %1097 = dma.done.wait (%p1408_p1), %s292_s22, 128  }
  0x5f   : > { %1099 = vsyncadd (%p1408_p1), %s292_s22, 4294967168  ;;  %p1409_p8 = scmp.eq.s32.totalorder %s1198_s28, 0 }
  0x61   : > { %1101 = dma.done.wait (%p1409_p8), [#allocation6], 1152   ;;  %p1410_p10 = pmov %p1409_p8 }
  0x62   : > { %p1411_p11 = pmov %p1409_p8 }
  0x63   : > { %1103 = vsyncadd (%p1410_p10), [#allocation6], 4294966144 }
  0x64   : > { %1105 = dma.done.wait (%p1411_p11), [#allocation9], 1024   ;;  %p1412_p2 = pmov %p1409_p8 }
  0x65   : > { %v1134_v0 = vmov 0.0   ;;  %vm1135_vm0 = vmmov 0   ;;  %v929_v1 = vld [vmem:[#allocation5] sm:$0xff]   ;;  %v339_v2 = vld [vmem:[%s295_s1] sm:$0xff]  ;;  %vm356_vm1 = vcmask 130048   ;;  %v933_v7 = vld [vmem:[#allocation7 + $0x20] sm:$0xff]  }
  0x66   : > { %1107 = vsyncadd (%p1412_p2), [#allocation9], 4294966272  ;;  %802 = vmatprep.subr.bf16.mxu0 %v1134_v0  ;;  %804 = vmatprep.mubr.msk.bf16.mxu0 %vm1135_vm0, %v1134_v0  ;;  %v340_v3 = vpack.c.bf16 %v339_v2, %v339_v2  ;;  %v930_v4 = vld [vmem:[#allocation7 + $0x38] sm:$0xff]   ;;  %v931_v5 = vld [vmem:[#allocation7 + $0x30] sm:$0xff]   ;;  %s756_s13 = sshll.u32 %s1303_s15, 2  ;;  %s779_s18 = sshll.u32 %s1198_s28, 6 }
  0x67   : > { %808 = vmatprep.subr.bf16.mxu1 %v1134_v0  ;;  %824 = vmatprep.mubr.msk.bf16.mxu1 %vm1135_vm0, %v1134_v0  ;;  %v932_v6 = vld [vmem:[#allocation7 + $0x28] sm:$0xff]   ;;  %v934_v8 = vld [vmem:[#allocation7 + $0x18] sm:$0xff]   ;;  %v935_v9 = vld [vmem:[#allocation7 + $0x10] sm:$0xff]   ;;  %s337_s19 = scalar_lea.vmem [#allocation10], %s756_s13  ;;  %s642_s12 = scalar_lea.hbm %s1391_s7, %s779_s18 }
  0x68   : > { %803 = vmatpush3.bf16.msra.mxu0 %v929_v1  ;;  %809 = vmatpush3.bf16.msra.mxu1 %v930_v4  ;;  %v936_v10 = vld [vmem:[#allocation7 + $0x8] sm:$0xff]   ;;  %v937_v11 = vld [vmem:[#allocation7] sm:$0xff]   ;;  %v938_v12 = vld [vmem:[#allocation8 + $0x38] sm:$0xff]   ;;  %s644_s16 = sshll.u32 %s337_s19, 4  ;;  %s631_s22 = scalar_lea.sflag [#allocation4], %s1303_s15  ;;  %s645_s16 = int_to_ptr.vmem [resolvable:$true] %s644_s16 }
  0x69   : > { %828 = vmatprep.subr.bf16.mxu0 %v1134_v0  ;;  %810 = vmatprep.subr.bf16.mxu1 %v1134_v0  ;;  %v939_v13 = vld [vmem:[#allocation8 + $0x30] sm:$0xff]   ;;  %v940_v14 = vld [vmem:[#allocation8 + $0x28] sm:$0xff]   ;;  %v941_v15 = vld [vmem:[#allocation8 + $0x20] sm:$0xff]   ;;  %s1054_s1 = scalar_lea.vmem %s645_s16, 64  ;;  %p1413_p6 = scmp.ne.s32.totalorder %s1405_s20, 0 }
  0x6a   : > { %v942_v16 = vld [vmem:[#allocation8 + $0x18] sm:$0xff]   ;;  %v943_v17 = vld [vmem:[#allocation8 + $0x10] sm:$0xff]   ;;  %v757_v18 = vld [vmem:[%s1386_s2] ss:$0 sm:$0xff]  ;;  %p1055_p4 = scmp.ne.s32.totalorder %s645_s16, %s1054_s1  ;;  %s1136_s3 = smov [#allocation10]  }
  0x6b   : > { %805 = vmatmul.mubr.msk.bf16.vlgmr.msra.gmra.mxu0 %vm356_vm1, %v340_v3  ;;  %v944_v26 = vld [vmem:[#allocation8 + $0x8] sm:$0xff]   ;;  %v945_v27 = vld [vmem:[#allocation8] sm:$0xff]   ;;  %s1058_s30 = sshll.u32 %s1136_s3, 4  ;;  %s1059_s30 = int_to_ptr.vmem [resolvable:$false] %s1058_s30 }
  0x6c   : > { %844 = vmatprep.mubr.msk.bf16.mxu0 %vm1135_vm0, %v1134_v0  ;;  %811 = vmatpush3.bf16.msra.mxu1 %v931_v5  ;;  %v760_v28 = vld [vmem:[%s1388_s4] ss:$0 sm:$0xff]  ;;  %p1056_p12 = pnand %p1055_p4, %p1413_p6  ;;  %s1060_s28 = scalar_lea.vmem %s1059_s30, 128 }
  0x6d   : > { %812 = vmatprep.subr.bf16.mxu1 %v1134_v0  ;;  %829 = vmatpush3.bf16.msra.mxu0 %v938_v12  ;;  %v769_v36 = vld [vmem:[%s1390_s6] ss:$0 sm:$0xff]  ;;  %p1061_p5 = scmp.lt.s32.totalorder %s645_s16, %s1059_s30  ;;  %p1062_p3 = scmp.lt.s32.totalorder %s1060_s28, %s1054_s1 }
  0x6e   : > { %830 = vmatprep.subr.bf16.mxu0 %v1134_v0  ;;  %p1057_p0 = pneg %p1056_p12 }
  0x6f   : > { %p1063_p7 = por %p1062_p3, %p1061_p5 }
  0x70   : > { %813 = vmatpush3.bf16.msra.mxu1 %v932_v6 }
  0x71   : > { %814 = vmatprep.subr.bf16.mxu1 %v1134_v0  ;;  %831 = vmatpush3.bf16.msra.mxu0 %v939_v13  ;;  %p1064_p9 = pnand %p1063_p7, %p1057_p0 }
  0x72   : > { %832 = vmatprep.subr.bf16.mxu0 %v1134_v0 }
  0x74   : > { %815 = vmatpush3.bf16.msra.mxu1 %v933_v7 }
  0x75   : > { %816 = vmatprep.subr.bf16.mxu1 %v1134_v0  ;;  %833 = vmatpush3.bf16.msra.mxu0 %v940_v14 }
  0x76   : > { %834 = vmatprep.subr.bf16.mxu0 %v1134_v0 }
  0x78   : > { %817 = vmatpush3.bf16.msra.mxu1 %v934_v8 }
  0x79   : > { %818 = vmatprep.subr.bf16.mxu1 %v1134_v0  ;;  %835 = vmatpush3.bf16.msra.mxu0 %v941_v15 }
  0x7a   : > { %836 = vmatprep.subr.bf16.mxu0 %v1134_v0 }
  0x7c   : > { %819 = vmatpush3.bf16.msra.mxu1 %v935_v9 }
  0x7d   : > { %820 = vmatprep.subr.bf16.mxu1 %v1134_v0  ;;  %837 = vmatpush3.bf16.msra.mxu0 %v942_v16 }
  0x7e   : > { %838 = vmatprep.subr.bf16.mxu0 %v1134_v0 }
  0x80   : > { %821 = vmatpush3.bf16.msra.mxu1 %v936_v10 }
  0x81   : > { %822 = vmatprep.subr.bf16.mxu1 %v1134_v0  ;;  %839 = vmatpush3.bf16.msra.mxu0 %v943_v17 }
  0x82   : > { %840 = vmatprep.subr.bf16.mxu0 %v1134_v0 }
  0x84   : > { %823 = vmatpush3.bf16.msra.mxu1 %v937_v11 }
  0x85   : > { %841 = vmatpush3.bf16.msra.mxu0 %v944_v26 }
  0x86   : > { %842 = vmatprep.subr.bf16.mxu0 %v1134_v0 }
  0x89   : > { %843 = vmatpush3.bf16.msra.mxu0 %v945_v27 }
 0x12b   : > { %v394_v19 = vpop.f32.mrf.mxu0 }
 0x12c   : > { %v395_v20 = vadd.f32 %v757_v18, %v394_v19 }
 0x12d   : > { %v806_v21 = vpop.f32.mrf.mxu0 }
 0x12e   : > { %v400_v22 = vmax.f32 %v395_v20, 0.0 }
 0x12f   : > { %v397_v23 = vpop.f32.mrf.mxu0 }
 0x130   : > { %v401_v24 = vpack.c.bf16 %v400_v22, %v400_v22 }
 0x131   : > { %v807_v25 = vpop.f32.mrf.mxu0 }
 0x132   : > { %825 = vmatmul.mubr.bf16.vlgmr.msra.gmra.mxu1 %v401_v24 }
 0x1f2   : > { %v507_v29 = vpop.f32.mrf.mxu1 }
 0x1f3   : > { %v508_v30 = vadd.f32 %v760_v28, %v507_v29 }
 0x1f4   : > { %v826_v31 = vpop.f32.mrf.mxu1 }
 0x1f5   : > { %v513_v32 = vmax.f32 %v508_v30, 0.0 }
 0x1f6   : > { %v510_v33 = vpop.f32.mrf.mxu1 }
 0x1f7   : > { %v514_v34 = vpack.c.bf16 %v513_v32, %v513_v32 }
 0x1f8   : > { %v827_v35 = vpop.f32.mrf.mxu1 }
 0x1f9   : > { %845 = vmatmul.mubr.bf16.vlgmr.msra.gmra.mxu0 %v514_v34 }
 0x2b9   : > { %v620_v37 = vpop.f32.mrf.mxu0 }
 0x2ba   : > { %v621_v38 = vadd.f32 %v769_v36, %v620_v37 }
 0x2bb   : > { %v846_v39 = vpop.f32.mrf.mxu0 }
 0x2bc   : > { %946 = vtanh.f32 %v621_v38 }
 0x2bd   : > { %v623_v40 = vpop.f32.mrf.mxu0 }
 0x2bf   : > { %v847_v41 = vpop.f32.mrf.mxu0 }
 0x2c9   : > { %v947_v42 = vpop.eup %946 }
 0x2ca   : > { %v627_v43 = vmul.f32 2.0, %v947_v42 }
 0x2cc   : > { %v628_v44 = vpack.c.bf16 %v627_v43, %v627_v43 }
 0x2ce   : > { %629 = vst [vmem:[%s337_s19] sm:$0xf] %v628_v44 }
 0x2cf   : > { %1067 = shalt.err (!%p1064_p9)
}
 0x2d0   : > { %s1068_s9 = scalar_lea.hbm %s642_s12, 64  ;;  %s1072_s10 = scalar_lea.hbm %s1391_s7, 128 }
 0x2d1   : > { %p1069_p13 = scmp.ne.s32.totalorder %s642_s12, %s1068_s9  ;;  %p1073_p10 = scmp.lt.s32.totalorder %s642_s12, %s1391_s7 }
 0x2d2   : > { %p1074_p11 = scmp.lt.s32.totalorder %s1072_s10, %s1068_s9 }
 0x2d3   : > { %p1070_p1 = pnand %p1069_p13, %p1413_p6 }
 0x2d4   : > { %p1075_p2 = por %p1074_p11, %p1073_p10 }
 0x2d5   : > { %p1071_p8 = pneg %p1070_p1 }
 0x2d7   : > { %p1076_p4 = pnand %p1075_p2, %p1071_p8 }
 0x2d9   : > { %1079 = shalt.err (!%p1076_p4)
}
 0x2da   : > { %862 = dma.vmem_to_hbm [thread:$0]  (%p1413_p6), %s645_s16, 64, %s642_s12, %s631_s22  }
 0x2db PF: > { %s656_s18 = sand.u32 1, %s1114_s24   ;;  %p1414_p12 = scmp.ne.s32.totalorder %s1399_s8, 0 }
 0x2dc   : > { %p1415_p0 = scmp.ge.s32.totalorder %s1126_s27, 2  ;;  %s657_s19 = scalar_lea.sflag [#allocation4], %s656_s18 }
 0x2de   : > { %p879_p5 = pnand %p1415_p0, %p1414_p12 }
 0x2e0   : > { %p880_p3 = pneg %p879_p5 }
 0x2e2   : > { %1109 = dma.done.wait (%p880_p3), %s657_s19, 64  }
 0x2e3   : > { %1111 = vsyncadd (%p880_p3), %s657_s19, 4294967232  ;;  %p22_p7 = scmp.ge.s32.totalorder %s1257_s14, 4   ;;  %s1416_s24 = smov %s1118_s25 }
 0x2e4   : > { %s1417_s25 = smov %s1122_s26  ;;  %s1418_s26 = smov %s1267_s17 }
 0x2e5   : > { %s1419_s27 = smov %s1257_s14  ;;  %24 = sbr.rel (!%p22_p7) target bundleno = 10 (0xa), region = 105 }
 0x2ea   :  { %662 = vsyncpa [#allocation3], 1 }
 0x2eb   :  { %664 = vsyncpa [#allocation3 + $0x1], 1 }
 0x2ec   :  { %665 = vsyncpa [#allocation6], 1 }
 0x2ed   :  { %666 = vsyncpa [#allocation9], 1 }
 0x2ee   :  { %667 = vsyncpa [#allocation4], 1 }
 0x2ef   :  { %669 = vsyncpa [#allocation4 + $0x1], 1 }

</bundles_post_ra>
